<compile_context>
chip_gen: v5e
topology: v5e:2x2
jax: 0.10.0
libtpu: 0.0.40
codegen_flags: <defaults>
</compile_context>

<pallas_src>
import functools
import numpy as np
import jax
import jax.numpy as jnp
from jax.experimental import pallas as pl
from jax.experimental.pallas import tpu as pltpu

# ----------------------------- model hyper-params ---------------------------
INPUT_HORIZON = 16
OUTPUT_HORIZON = 8
N_COLS = 4
N_FC_LAYERS = 1
CNN_UNITS_LIST = [8, 8]
KERNEL_SIZE = 3
DENSE_UNITS = 32
DILATION = 2           # fixed to 2 in the PyTorch module
PAD_WIDTH = 128        # common lane width of the packed parameter slab


# ------------------------------ fused Pallas kernel --------------------------
def _fused_forward_kernel(x_ref, p_ref, o_ref, *, w_offsets, bias_base,
                          relu_flags, out_dim):
    """Whole forward for one batch tile: chained matmul + bias (+ReLU) in regs.

    x_ref : (b_tile, Cin*L)   raw input, row-major flatten of (B, Cin, L)
    p_ref : (rows, 128)       packed slab: Toeplitz conv weights, padded FC
                              weights, then one (padded) bias row per layer
    o_ref : (b_tile, out_dim)
    """
    h = x_ref[...]                                           # (b_tile, Cin*L)
    for j, do_relu in enumerate(relu_flags):
        w = p_ref[w_offsets[j]:w_offsets[j + 1], :]          # static slice
        b = p_ref[bias_base + j:bias_base + j + 1, :]        # (1, 128)
        h = jnp.dot(h, w, preferred_element_type=jnp.float32) + b
        if do_relu:
            h = jnp.maximum(h, 0.0)
    o_ref[...] = h[:, :out_dim]


# ------------------------------ parameter prep -------------------------------
def prepare_params(conv_params, fc_params):
    """One-time layout transforms: PyTorch layouts -> one packed kernel slab.

    Conv layers become zero-padded block-Toeplitz matrices so each conv is a
    single lane-dense matmul (the zero FLOPs are irrelevant at these sizes).
    All layer weights are column-padded (and, after layer 0, row-padded) to a
    common 128-lane width; padded activation columns stay exactly zero through
    the whole chain, so padding never changes the result.
    """
    assert DILATION == 2, "same-length conv output relies on dilation == 2"
    L, k, dil, pad = INPUT_HORIZON, KERNEL_SIZE, DILATION, KERNEL_SIZE - 1
    PW = PAD_WIDTH

    layer_ws, layer_bs, relu_flags = [], [], []

    # ---- conv layers -> block-Toeplitz matmuls ------------------------------
    for li, (w_oik, bias) in enumerate(conv_params):          # w: (Cout, Cin, K)
        w = np.asarray(w_oik, np.float32)
        b = np.asarray(bias, np.float32)
        cout, cin, _ = w.shape
        dout = L * cout
        assert dout <= PW and L * cin <= PW
        din = cin * L if li == 0 else PW                      # raw input width / padded
        T = np.zeros((din, PW), np.float32)
        for lo in range(L):
            for t in range(k):
                lin = lo + t * dil - pad                      # implicit zero padding
                if 0 <= lin < L:
                    blk = w[:, :, t].T                        # (Cin, Cout)
                    if li == 0:
                        # raw input flat index = ci*L + lin (channels-first, row-major)
                        T[lin::L, lo * cout:(lo + 1) * cout] += blk
                    else:
                        # running activation flat index = lin*Cin + ci (position-major)
                        T[lin * cin:(lin + 1) * cin, lo * cout:(lo + 1) * cout] += blk
        layer_ws.append(T)
        brow = np.zeros((PW,), np.float32)
        brow[:dout] = np.tile(b, L)                           # bias per position/channel
        layer_bs.append(brow)
        relu_flags.append(True)

    c_last = conv_params[-1][0].shape[0]
    F = c_last * L                                            # conv flat width (l*C + c)

    # ---- FC layers -----------------------------------------------------------
    n_fc = len(fc_params)
    for j, (w_oi, bias) in enumerate(fc_params):              # w: (Out, In)
        w = np.asarray(w_oi, np.float32)
        b = np.asarray(bias, np.float32)
        dout, din = w.shape
        assert dout <= PW and din <= PW
        wt = w.T                                              # (In, Out)
        if j == 0:
            # PyTorch flatten of (B, C, L) gives index c*L + l; the running
            # activation is position-major (l*C + c) -> permute rows.
            wt = wt.reshape(c_last, L, dout).transpose(1, 0, 2).reshape(F, dout)
        Wp = np.zeros((PW, PW), np.float32)
        Wp[:wt.shape[0], :dout] = wt
        layer_ws.append(Wp)
        brow = np.zeros((PW,), np.float32)
        brow[:dout] = b
        layer_bs.append(brow)
        relu_flags.append((N_FC_LAYERS > 0) and (j < n_fc - 1))

    # ---- pack everything into one contiguous slab ----------------------------
    w_offsets = [0]
    for W in layer_ws:
        w_offsets.append(w_offsets[-1] + W.shape[0])
    bias_base = w_offsets[-1]
    slab = np.concatenate(layer_ws + [np.stack(layer_bs, axis=0)], axis=0)

    return dict(
        slab=jnp.asarray(slab),                 # (rows, 128) f32
        w_offsets=tuple(int(o) for o in w_offsets),
        bias_base=int(bias_base),
        relu_flags=tuple(bool(f) for f in relu_flags),
        out_dim=int(fc_params[-1][0].shape[0]),
    )


def init_params(key):
    """Deterministic synthetic parameters in PyTorch layouts."""
    conv_channels = [N_COLS] + CNN_UNITS_LIST
    conv_params = []  # list of (weight (Cout, Cin, K), bias (Cout,))
    for i in range(len(CNN_UNITS_LIST)):
        cin, cout = conv_channels[i], conv_channels[i + 1]
        key, kw, kb = jax.random.split(key, 3)
        w = 0.1 * jax.random.normal(kw, (cout, cin, KERNEL_SIZE), jnp.float32)
        bias = 0.1 * jax.random.normal(kb, (cout,), jnp.float32)
        conv_params.append((w, bias))

    fc_dims = []
    feat = CNN_UNITS_LIST[-1] * INPUT_HORIZON
    if N_FC_LAYERS == 0:
        fc_dims.append((feat, OUTPUT_HORIZON))
    else:
        fc_dims.append((feat, DENSE_UNITS))
        for _ in range(N_FC_LAYERS - 1):
            fc_dims.append((DENSE_UNITS, DENSE_UNITS))
        fc_dims.append((DENSE_UNITS, OUTPUT_HORIZON))

    fc_params = []  # list of (weight (Out, In), bias (Out,)) in PyTorch layout
    for (din, dout) in fc_dims:
        key, kw, kb = jax.random.split(key, 3)
        w = 0.1 * jax.random.normal(kw, (dout, din), jnp.float32)
        bias = 0.1 * jax.random.normal(kb, (dout,), jnp.float32)
        fc_params.append((w, bias))
    return conv_params, fc_params


# ------------------------------ forward passes ------------------------------
def build_forward(prep, *, b_tile=256):
    """Returns a jitted forward fn (x_ncl, slab) -> (B, 1, out_dim)."""
    kern = functools.partial(
        _fused_forward_kernel,
        w_offsets=prep["w_offsets"],
        bias_base=prep["bias_base"],
        relu_flags=prep["relu_flags"],
        out_dim=prep["out_dim"])
    out_dim = prep["out_dim"]

    def fwd(x_ncl, slab):
        B = x_ncl.shape[0]
        # Free metadata reshape; the c*L + l ordering is folded into the first
        # Toeplitz weight's rows (no transpose op in the wrapper).
        x_flat = x_ncl.reshape(B, -1)                        # (B, Cin*L)
        bt = b_tile if (b_tile <= B and B % b_tile == 0) else B
        grid = (B // bt,)
        out = pl.pallas_call(
            kern,
            out_shape=jax.ShapeDtypeStruct((B, out_dim), jnp.float32),
            grid=grid,
            in_specs=[
                pl.BlockSpec((bt, x_flat.shape[1]), lambda i: (i, 0)),
                pl.BlockSpec(slab.shape, lambda i: (0, 0)),   # resident params
            ],
            out_specs=pl.BlockSpec((bt, out_dim), lambda i: (i, 0)),
            compiler_params=pltpu.CompilerParams(
                dimension_semantics=("parallel",)),
        )(x_flat, slab)
        return out.reshape(B, 1, out_dim)

    return jax.jit(fwd)


def reference_forward(x_ncl, conv_params, fc_params):
    """Plain-JAX reference matching the PyTorch forward (eval mode)."""
    x = x_ncl
    pad = KERNEL_SIZE - 1
    for (w_oik, bias) in conv_params:
        x = jax.lax.conv_general_dilated(
            x, w_oik, window_strides=(1,), padding=[(pad, pad)],
            rhs_dilation=(DILATION,), dimension_numbers=('NCH', 'OIH', 'NCH'))
        x = jnp.maximum(x + bias[None, :, None], 0.0)
    x = x.reshape(x.shape[0], -1)
    n_fc = len(fc_params)
    for i, (w_oi, bias) in enumerate(fc_params):
        x = x @ w_oi.T + bias
        if (N_FC_LAYERS > 0) and (i < n_fc - 1):
            x = jnp.maximum(x, 0.0)
    return x.reshape(-1, 1, x.shape[-1])


# ----------------------------------- main ------------------------------------
if __name__ == "__main__":
    key = jax.random.PRNGKey(0)
    key, kx, kp = jax.random.split(key, 3)
    batch = 2
    x = jax.random.normal(kx, (batch, N_COLS, INPUT_HORIZON), jnp.float32)

    conv_params, fc_params = init_params(kp)
    prep = prepare_params(conv_params, fc_params)     # one-time layout prep

    fwd = build_forward(prep)
    out = jax.block_until_ready(fwd(x, prep["slab"]))

    ref = reference_forward(x, conv_params, fc_params)
    assert out.shape == (batch, 1, OUTPUT_HORIZON), out.shape
    np.testing.assert_allclose(np.asarray(out), np.asarray(ref),
                               rtol=1e-4, atol=1e-5)
    print("KERNEL_OK")
</pallas_src>

<mosaic_0001>
module attributes {stable_mosaic.version = 11 : i64} {
  func.func @_fused_forward_kernel(%arg0: i32, %arg1: memref<2x64xf32, #tpu.memory_space<vmem>>, %arg2: memref<452x128xf32, #tpu.memory_space<vmem>>, %arg3: memref<2x8xf32, #tpu.memory_space<vmem>>) attributes {dimension_semantics = [#tpu.dimension_semantics<parallel>], iteration_bounds = array<i64: 1>, scalar_prefetch = 0 : i64, scratch_operands = 0 : i64, tpu.core_type = #tpu.core_type<tc>, window_params = [{transform_indices = @transform_0, window_bounds = array<i64: 2, 64>}, {pipeline_mode = #tpu.pipeline_mode<synchronous>, transform_indices = @transform_1, window_bounds = array<i64: 452, 128>}, {transform_indices = @transform_2, window_bounds = array<i64: 2, 8>}]} {
    %c0 = arith.constant 0 : index
    %c0_0 = arith.constant 0 : index
    %0 = vector.load %arg1[%c0, %c0_0] : memref<2x64xf32, #tpu.memory_space<vmem>>, vector<2x64xf32>
    %c0_1 = arith.constant 0 : index
    %c0_2 = arith.constant 0 : index
    %1 = vector.load %arg2[%c0_1, %c0_2] : memref<452x128xf32, #tpu.memory_space<vmem>>, vector<64x128xf32>
    %c448 = arith.constant 448 : index
    %c0_3 = arith.constant 0 : index
    %2 = vector.load %arg2[%c448, %c0_3] : memref<452x128xf32, #tpu.memory_space<vmem>>, vector<1x128xf32>
    %cst = arith.constant dense<0.000000e+00> : vector<2x128xf32>
    %3 = tpu.matmul %0, %1, %cst {dimension_numbers = #tpu.dot_dimension_numbers<[1], [0], [0], [1], [0, 0, 1, 1], [], []>} : vector<2x64xf32>, vector<64x128xf32>, vector<2x128xf32> -> vector<2x128xf32>
    %4 = vector.broadcast %2 : vector<1x128xf32> to vector<2x128xf32>
    %5 = arith.addf %3, %4 : vector<2x128xf32>
    %cst_4 = arith.constant 0.000000e+00 : f32
    %6 = vector.broadcast %cst_4 : f32 to vector<2x128xf32>
    %7 = arith.maximumf %5, %6 : vector<2x128xf32>
    %c64 = arith.constant 64 : index
    %c0_5 = arith.constant 0 : index
    %8 = vector.load %arg2[%c64, %c0_5] : memref<452x128xf32, #tpu.memory_space<vmem>>, vector<128x128xf32>
    %c449 = arith.constant 449 : index
    %c0_6 = arith.constant 0 : index
    %9 = vector.load %arg2[%c449, %c0_6] : memref<452x128xf32, #tpu.memory_space<vmem>>, vector<1x128xf32>
    %cst_7 = arith.constant dense<0.000000e+00> : vector<2x128xf32>
    %10 = tpu.matmul %7, %8, %cst_7 {dimension_numbers = #tpu.dot_dimension_numbers<[1], [0], [0], [1], [0, 0, 1, 1], [], []>} : vector<2x128xf32>, vector<128x128xf32>, vector<2x128xf32> -> vector<2x128xf32>
    %11 = vector.broadcast %9 : vector<1x128xf32> to vector<2x128xf32>
    %12 = arith.addf %10, %11 : vector<2x128xf32>
    %cst_8 = arith.constant 0.000000e+00 : f32
    %13 = vector.broadcast %cst_8 : f32 to vector<2x128xf32>
    %14 = arith.maximumf %12, %13 : vector<2x128xf32>
    %c192 = arith.constant 192 : index
    %c0_9 = arith.constant 0 : index
    %15 = vector.load %arg2[%c192, %c0_9] : memref<452x128xf32, #tpu.memory_space<vmem>>, vector<128x128xf32>
    %c450 = arith.constant 450 : index
    %c0_10 = arith.constant 0 : index
    %16 = vector.load %arg2[%c450, %c0_10] : memref<452x128xf32, #tpu.memory_space<vmem>>, vector<1x128xf32>
    %cst_11 = arith.constant dense<0.000000e+00> : vector<2x128xf32>
    %17 = tpu.matmul %14, %15, %cst_11 {dimension_numbers = #tpu.dot_dimension_numbers<[1], [0], [0], [1], [0, 0, 1, 1], [], []>} : vector<2x128xf32>, vector<128x128xf32>, vector<2x128xf32> -> vector<2x128xf32>
    %18 = vector.broadcast %16 : vector<1x128xf32> to vector<2x128xf32>
    %19 = arith.addf %17, %18 : vector<2x128xf32>
    %cst_12 = arith.constant 0.000000e+00 : f32
    %20 = vector.broadcast %cst_12 : f32 to vector<2x128xf32>
    %21 = arith.maximumf %19, %20 : vector<2x128xf32>
    %c320 = arith.constant 320 : index
    %c0_13 = arith.constant 0 : index
    %22 = vector.load %arg2[%c320, %c0_13] : memref<452x128xf32, #tpu.memory_space<vmem>>, vector<128x128xf32>
    %c451 = arith.constant 451 : index
    %c0_14 = arith.constant 0 : index
    %23 = vector.load %arg2[%c451, %c0_14] : memref<452x128xf32, #tpu.memory_space<vmem>>, vector<1x128xf32>
    %cst_15 = arith.constant dense<0.000000e+00> : vector<2x128xf32>
    %24 = tpu.matmul %21, %22, %cst_15 {dimension_numbers = #tpu.dot_dimension_numbers<[1], [0], [0], [1], [0, 0, 1, 1], [], []>} : vector<2x128xf32>, vector<128x128xf32>, vector<2x128xf32> -> vector<2x128xf32>
    %25 = vector.broadcast %23 : vector<1x128xf32> to vector<2x128xf32>
    %26 = arith.addf %24, %25 : vector<2x128xf32>
    %27 = vector.extract_strided_slice %26 {offsets = [0, 0], sizes = [2, 8], strides = [1, 1]} : vector<2x128xf32> to vector<2x8xf32>
    %c0_16 = arith.constant 0 : index
    %c0_17 = arith.constant 0 : index
    %28 = vector.load %arg3[%c0_16, %c0_17] : memref<2x8xf32, #tpu.memory_space<vmem>>, vector<2x8xf32>
    tpu.vector_store %arg3[%c0_16, %c0_17], %27 {strides = array<i32>} : memref<2x8xf32, #tpu.memory_space<vmem>>, vector<2x8xf32>,
    return
  }
  func.func @transform_0(%arg0: i32) -> (i32, i32) {
    %c0_i32 = arith.constant 0 : i32
    %c0_i32_0 = arith.constant 0 : i32
    return %arg0, %c0_i32 : i32, i32
  }
  func.func @transform_1(%arg0: i32) -> (i32, i32) {
    %c0_i32 = arith.constant 0 : i32
    %c0_i32_0 = arith.constant 0 : i32
    %c0_i32_1 = arith.constant 0 : i32
    return %c0_i32, %c0_i32_0 : i32, i32
  }
  func.func @transform_2(%arg0: i32) -> (i32, i32) {
    %c0_i32 = arith.constant 0 : i32
    %c0_i32_0 = arith.constant 0 : i32
    return %arg0, %c0_i32 : i32, i32
  }
}

</mosaic_0001>

<bundles_post_ra>
// kernel: fwd.1
= control target key start
LH: loop header
LB: loop body
LE: loop exit
PB: predicated region body
PF: predicated region fallthrough
CT: control target
= control target key end

     0   :  { %7 = vsyncpa [#allocation3], 0  ;;  %s288_s0 = inlined_call_operand.vmem [shape: f32[2,64], index: 0, kind: input, shape index: {}]   ;;  %s289_s1 = inlined_call_operand.hbm [shape: f32[452,128], index: 1, kind: input, shape index: {}]   ;;  %s290_s2 = inlined_call_operand.hbm [shape: f32[2,8], index: 2, kind: output, shape index: {}]  }
   0x1   :  { %8 = vsyncpa [#allocation4], 0  ;;  %s15_s11 = sshll.u32 %s289_s1, 4  ;;  %s260_s12 = smov [#allocation2]   ;;  %s16_s11 = int_to_ptr.hbm [resolvable:$true] %s15_s11 }
   0x2   :  { %s17_s13 = sshll.u32 %s260_s12, 4  ;;  %s261_s14 = smov 128   ;;  %s18_s13 = int_to_ptr.vmem [resolvable:$true] %s17_s13 }
   0x3   :  { %s262_s15 = smov 8  }
   0x4   :  { %23 = dma.hbm_to_vmem [thread:$0]  %s16_s11, 7296, %s18_s13, [#allocation3], %s261_s14, %s261_s14, %s262_s15  }
   0x5   :  { %256 = dma.done.wait [#allocation3], 7296  }
   0x6   :  { %257 = vsyncadd [#allocation3], 4294960000  ;;  %v36_v0 = vld [vmem:[#allocation2 + $0x38] sm:$0xff]  ;;  %v35_v1 = vld [vmem:[#allocation2 + $0x30] sm:$0xff]  ;;  %vm39_vm0 = vcmask 523264   ;;  %s189_s20 = sshll.u32 %s290_s2, 4  ;;  %s190_s20 = int_to_ptr.hbm [resolvable:$true] %s189_s20 }
   0x7   :  { %51 = vmatpush.msra.mxu0 %v36_v0  ;;  %v34_v2 = vld [vmem:[#allocation2 + $0x28] sm:$0xff]  ;;  %v79_v3 = vld [vmem:[#allocation2 + $0xb8] sm:$0xff]  ;;  %v78_v4 = vld [vmem:[#allocation2 + $0xb0] sm:$0xff]  ;;  %vm180_vm1 = vcmask 58368  }
   0x8   :  { %v33_v5 = vld [vmem:[#allocation2 + $0x20] sm:$0xff]  ;;  %82 = vmatpush.msra.mxu1 %v79_v3  ;;  %v77_v6 = vld [vmem:[#allocation2 + $0xa8] sm:$0xff]  ;;  %v32_v7 = vld [vmem:[#allocation2 + $0x18] sm:$0xff] }
   0x9   :  { %52 = vmatpush.msra.mxu0 %v35_v1  ;;  %v31_v8 = vld [vmem:[#allocation2 + $0x10] sm:$0xff]  ;;  %v76_v9 = vld [vmem:[#allocation2 + $0xa0] sm:$0xff]  ;;  %v75_v10 = vld [vmem:[#allocation2 + $0x98] sm:$0xff] }
   0xa   :  { %83 = vmatpush.msra.mxu1 %v78_v4  ;;  %v30_v11 = vld [vmem:[#allocation2 + $0x8] sm:$0xff]  ;;  %v74_v12 = vld [vmem:[#allocation2 + $0x90] sm:$0xff]  ;;  %v29_v13 = vld [vmem:[#allocation2] sm:$0xff] }
   0xb   :  { %53 = vmatpush.msra.mxu0 %v34_v2  ;;  %v28_v14 = vld [vmem:[%s288_s0] sm:$0x3]  ;;  %v73_v15 = vld [vmem:[#allocation2 + $0x88] sm:$0xff]  ;;  %v71_v17 = vld [vmem:[#allocation2 + $0x78] sm:$0xff]  ;;  %s263_s0 = smov [#allocation5]  }
   0xc   :  { %84 = vmatpush.msra.mxu1 %v77_v6  ;;  %v72_v16 = vld [vmem:[#allocation2 + $0x80] sm:$0xff]  ;;  %v70_v18 = vld [vmem:[#allocation2 + $0x70] sm:$0xff]  ;;  %v69_v19 = vld [vmem:[#allocation2 + $0x68] sm:$0xff]  ;;  %s187_s17 = sshll.u32 %s263_s0, 4  ;;  %s188_s17 = int_to_ptr.vmem [resolvable:$true] %s187_s17 }
   0xd   :  { %54 = vmatpush.msra.mxu0 %v33_v5  ;;  %v68_v20 = vld [vmem:[#allocation2 + $0x60] sm:$0xff]  ;;  %v67_v21 = vld [vmem:[#allocation2 + $0x58] sm:$0xff]  ;;  %v66_v22 = vld [vmem:[#allocation2 + $0x50] sm:$0xff] }
   0xe   :  { %85 = vmatpush.msra.mxu1 %v76_v9  ;;  %v65_v23 = vld [vmem:[#allocation2 + $0x48] sm:$0xff]  ;;  %v64_v24 = vld [vmem:[#allocation2 + $0x40] sm:$0xff]  ;;  %v118_v25 = vld [vmem:[#allocation2 + $0x138] sm:$0xff] }
   0xf   :  { %55 = vmatpush.msra.mxu0 %v32_v7  ;;  %v117_v26 = vld [vmem:[#allocation2 + $0x130] sm:$0xff]  ;;  %121 = vmatpush.msra.mxu2 %v118_v25  ;;  %v116_v27 = vld [vmem:[#allocation2 + $0x128] sm:$0xff]  ;;  %v115_v28 = vld [vmem:[#allocation2 + $0x120] sm:$0xff] }
  0x10   :  { %86 = vmatpush.msra.mxu1 %v75_v10  ;;  %v114_v29 = vld [vmem:[#allocation2 + $0x118] sm:$0xff]  ;;  %v113_v30 = vld [vmem:[#allocation2 + $0x110] sm:$0xff]  ;;  %v112_v31 = vld [vmem:[#allocation2 + $0x108] sm:$0xff] }
  0x11   :  { %56 = vmatpush.msra.mxu0 %v31_v8  ;;  %122 = vmatpush.msra.mxu2 %v117_v26  ;;  %v111_v32 = vld [vmem:[#allocation2 + $0x100] sm:$0xff]  ;;  %v110_v33 = vld [vmem:[#allocation2 + $0xf8] sm:$0xff]  ;;  %v109_v34 = vld [vmem:[#allocation2 + $0xf0] sm:$0xff] }
  0x12   :  { %87 = vmatpush.msra.mxu1 %v74_v12  ;;  %v108_v35 = vld [vmem:[#allocation2 + $0xe8] sm:$0xff]  ;;  %v107_v36 = vld [vmem:[#allocation2 + $0xe0] sm:$0xff]  ;;  %v106_v37 = vld [vmem:[#allocation2 + $0xd8] sm:$0xff] }
  0x13   :  { %57 = vmatpush.msra.mxu0 %v30_v11  ;;  %123 = vmatpush.msra.mxu2 %v116_v27  ;;  %v204_v38 = vld [vmem:[#allocation2 + $0x1c0] ss:$0 sm:$0xff]  ;;  %v105_v42 = vld [vmem:[#allocation2 + $0xd0] sm:$0xff]  ;;  %v104_v43 = vld [vmem:[#allocation2 + $0xc8] sm:$0xff] }
  0x14   :  { %88 = vmatpush.msra.mxu1 %v73_v15  ;;  %v103_v44 = vld [vmem:[#allocation2 + $0xc0] sm:$0xff]  ;;  %v157_v45 = vld [vmem:[#allocation2 + $0x1b8] sm:$0xff]  ;;  %v156_v46 = vld [vmem:[#allocation2 + $0x1b0] sm:$0xff] }
  0x15   :  { %58 = vmatpush.msra.mxu0 %v29_v13  ;;  %124 = vmatpush.msra.mxu2 %v115_v28  ;;  %v155_v47 = vld [vmem:[#allocation2 + $0x1a8] sm:$0xff]  ;;  %v154_v48 = vld [vmem:[#allocation2 + $0x1a0] sm:$0xff]  ;;  %v153_v49 = vld [vmem:[#allocation2 + $0x198] sm:$0xff] }
  0x16   :  { %199 = vmatmul.msk.f32.vlgmr.msra.gmra.mxu0 %vm39_vm0, %v28_v14  ;;  %89 = vmatpush.msra.mxu1 %v72_v16  ;;  %v152_v50 = vld [vmem:[#allocation2 + $0x190] sm:$0xff]  ;;  %v151_v51 = vld [vmem:[#allocation2 + $0x188] sm:$0xff]  ;;  %v150_v52 = vld [vmem:[#allocation2 + $0x180] sm:$0xff] }
  0x17   :  { %125 = vmatpush.msra.mxu2 %v114_v29  ;;  %160 = vmatpush.msra.mxu3 %v157_v45  ;;  %v149_v53 = vld [vmem:[#allocation2 + $0x178] sm:$0xff]  ;;  %v148_v54 = vld [vmem:[#allocation2 + $0x170] sm:$0xff]  ;;  %v147_v55 = vld [vmem:[#allocation2 + $0x168] sm:$0xff] }
  0x18   :  { %90 = vmatpush.msra.mxu1 %v71_v17  ;;  %v146_v56 = vld [vmem:[#allocation2 + $0x160] sm:$0xff]  ;;  %v145_v57 = vld [vmem:[#allocation2 + $0x158] sm:$0xff]  ;;  %v144_v62 = vld [vmem:[#allocation2 + $0x150] sm:$0xff] }
  0x19   :  { %126 = vmatpush.msra.mxu2 %v113_v30  ;;  %161 = vmatpush.msra.mxu3 %v156_v46  ;;  %v205_v58 = vld [vmem:[#allocation2 + $0x1c1] ss:$0 sm:$0xff]  ;;  %v143_v63 = vld [vmem:[#allocation2 + $0x148] sm:$0xff]  ;;  %v206_v1 = vld [vmem:[#allocation2 + $0x1c2] ss:$0 sm:$0xff] }
  0x1a   :  { %91 = vmatpush.msra.mxu1 %v70_v18  ;;  %v142_v0 = vld [vmem:[#allocation2 + $0x140] sm:$0xff] }
  0x1b   :  { %127 = vmatpush.msra.mxu2 %v112_v31  ;;  %162 = vmatpush.msra.mxu3 %v155_v47  ;;  %v207_v5 = vld [vmem:[#allocation2 + $0x1c3] ss:$0 sm:$0xff] }
  0x1c   :  { %92 = vmatpush.msra.mxu1 %v69_v19 }
  0x1d   :  { %128 = vmatpush.msra.mxu2 %v111_v32  ;;  %163 = vmatpush.msra.mxu3 %v154_v48 }
  0x1e   :  { %93 = vmatpush.msra.mxu1 %v68_v20 }
  0x1f   :  { %129 = vmatpush.msra.mxu2 %v110_v33  ;;  %164 = vmatpush.msra.mxu3 %v153_v49 }
  0x20   :  { %94 = vmatpush.msra.mxu1 %v67_v21 }
  0x21   :  { %130 = vmatpush.msra.mxu2 %v109_v34  ;;  %165 = vmatpush.msra.mxu3 %v152_v50 }
  0x22   :  { %95 = vmatpush.msra.mxu1 %v66_v22 }
  0x23   :  { %131 = vmatpush.msra.mxu2 %v108_v35  ;;  %166 = vmatpush.msra.mxu3 %v151_v51 }
  0x24   :  { %96 = vmatpush.msra.mxu1 %v65_v23 }
  0x25   :  { %132 = vmatpush.msra.mxu2 %v107_v36  ;;  %167 = vmatpush.msra.mxu3 %v150_v52 }
  0x26   :  { %97 = vmatpush.msra.mxu1 %v64_v24 }
  0x27   :  { %133 = vmatpush.msra.mxu2 %v106_v37  ;;  %168 = vmatpush.msra.mxu3 %v149_v53 }
  0x29   :  { %134 = vmatpush.msra.mxu2 %v105_v42  ;;  %169 = vmatpush.msra.mxu3 %v148_v54 }
  0x2b   :  { %135 = vmatpush.msra.mxu2 %v104_v43  ;;  %170 = vmatpush.msra.mxu3 %v147_v55 }
  0x2d   :  { %136 = vmatpush.msra.mxu2 %v103_v44  ;;  %171 = vmatpush.msra.mxu3 %v146_v56 }
  0x2f   :  { %172 = vmatpush.msra.mxu3 %v145_v57 }
  0x31   :  { %173 = vmatpush.msra.mxu3 %v144_v62 }
  0x33   :  { %174 = vmatpush.msra.mxu3 %v143_v63 }
  0x35   :  { %175 = vmatpush.msra.mxu3 %v142_v0 }
  0x93   :  { %v60_v39 = vpop.f32.mrf.mxu0 }
  0x94   :  { %v61_v40 = vadd.f32 %v204_v38, %v60_v39 }
  0x96   :  { %v63_v41 = vmax.f32 %v61_v40, 0.0 }
  0x98   :  { %98 = vmatmul.f32.vlgmr.msra.gmra.mxu1 %v63_v41 }
 0x115   :  { %v99_v59 = vpop.f32.mrf.mxu1 }
 0x116   :  { %v100_v60 = vadd.f32 %v205_v58, %v99_v59 }
 0x118   :  { %v102_v61 = vmax.f32 %v100_v60, 0.0 }
 0x11a   :  { %137 = vmatmul.f32.vlgmr.msra.gmra.mxu2 %v102_v61 }
 0x19d   :  { %v138_v2 = vpop.f32.mrf.mxu2 }
 0x19e   :  { %v139_v3 = vadd.f32 %v206_v1, %v138_v2 }
 0x1a0   :  { %v141_v4 = vmax.f32 %v139_v3, 0.0 }
 0x1a2   :  { %176 = vmatmul.f32.vlgmr.msra.gmra.mxu3 %v141_v4 }
 0x225   :  { %v177_v6 = vpop.f32.mrf.mxu3 }
 0x226   :  { %v178_v7 = vadd.f32 %v207_v5, %v177_v6 }
 0x228   :  { %181 = vst.msk [vmem:[#allocation5] sm:$0x3] %vm180_vm1, %v178_v7 }
 0x229   :  { %192 = dma.vmem_to_hbm [thread:$0]  %s188_s17, 32, %s190_s20, [#allocation4]  }
 0x22a   :  { %258 = dma.done.wait [#allocation4], 32  }
 0x22b   :  { %259 = vsyncadd [#allocation4], 4294967264 }
 0x22c   :  { %197 = vsyncpa [#allocation3], 1 }
 0x22d   :  { %198 = vsyncpa [#allocation4], 1 }

</bundles_post_ra>
